<compile_context>
chip_gen: v6e
topology: v6e:2x2x1
jax: 0.10.0
libtpu: 0.0.40
codegen_flags: <defaults>
</compile_context>

<pallas_src>
import functools

import jax
import jax.numpy as jnp
from jax.experimental import pallas as pl
from jax.experimental.pallas import tpu as pltpu


def _round_up(x, m):
    return (x + m - 1) // m * m


def _temp_model_kernel(ids_ref, mask_ref, numf_ref, labels_ref,
                       emb_ref, w_emb_ref, w_num_ref, bias_ref, temp_ref,
                       logits_ref, nll_ref, *, num_classes):
    ids = ids_ref[...]                                    # (TB, S) int32
    mask = mask_ref[...]                                  # (TB, S) f32
    tb, s = ids.shape
    vocab = emb_ref.shape[0]
    c_pad = logits_ref.shape[1]

    # ---- in-kernel embedding "gather" + masked mean pooling -----------------
    # counts[b, v] = sum_s mask[b, s] * [ids[b, s] == v]          -> (TB, V)
    # pooled       = (counts @ embedding) / max(sum_s mask, 1)    -> (TB, H)
    vocab_iota = jax.lax.broadcasted_iota(jnp.int32, (tb, s, vocab), 2)
    weighted_onehot = jnp.where(ids[:, :, None] == vocab_iota,
                                mask[:, :, None], 0.0)            # (TB, S, V)
    counts = jnp.sum(weighted_onehot, axis=1)                     # (TB, V)
    msum = jnp.sum(mask, axis=1, keepdims=True)                   # (TB, 1)
    inv_msum = 1.0 / jnp.maximum(msum, 1.0)
    pooled = jnp.dot(counts, emb_ref[...],
                     preferred_element_type=jnp.float32) * inv_msum   # (TB, H)

    # ---- classifier head (class dim pre-padded to 128 lanes in the wrapper) --
    logits = (jnp.dot(pooled, w_emb_ref[...], preferred_element_type=jnp.float32)
              + jnp.dot(numf_ref[...], w_num_ref[...],
                        preferred_element_type=jnp.float32)
              + bias_ref[...])                                    # (TB, C_pad)

    # ---- mean cross-entropy on the *raw* logits (real classes only) ---------
    cls = jax.lax.broadcasted_iota(jnp.int32, (tb, c_pad), 1)
    masked_logits = jnp.where(cls < num_classes, logits, jnp.float32(-1e30))
    m = jnp.max(masked_logits, axis=1, keepdims=True)
    z = masked_logits - m
    lse = jnp.log(jnp.sum(jnp.exp(z), axis=1, keepdims=True))
    log_probs = z - lse                                           # (TB, C_pad)
    picked = jnp.sum(jnp.where(cls == labels_ref[...], log_probs, 0.0),
                     axis=1, keepdims=True)                       # (TB, 1)
    nll_ref[...] = -picked            # per-row NLL; averaged in the wrapper

    # ---- temperature scaling: one scalar reciprocal, then a multiply --------
    inv_t = 1.0 / temp_ref[0, 0]
    logits_ref[...] = logits * inv_t


def model_with_temperature_forward(params, input_ids, attention_mask,
                                   numerical_features, labels, *, tile_b=8):
    """Returns (loss, temperature-scaled logits), mirroring the PyTorch forward."""
    B, S = input_ids.shape
    V, H = params["embedding"].shape
    F = numerical_features.shape[1]
    C = params["w_emb"].shape[1]

    c_pad = _round_up(C, 128)                 # lane-dense logits / MXU N tile
    num_tiles = pl.cdiv(B, tile_b)
    b_pad = num_tiles * tile_b

    ids = input_ids.astype(jnp.int32)
    mask = attention_mask.astype(jnp.float32)
    numf = numerical_features.astype(jnp.float32)
    lab = labels.astype(jnp.int32).reshape(B, 1)
    if b_pad != B:
        pad = b_pad - B
        ids = jnp.pad(ids, ((0, pad), (0, 0)))
        mask = jnp.pad(mask, ((0, pad), (0, 0)))   # mask=0 -> padded rows inert
        numf = jnp.pad(numf, ((0, pad), (0, 0)))
        lab = jnp.pad(lab, ((0, pad), (0, 0)))

    emb_table = params["embedding"].astype(jnp.float32)                      # (V, H)
    w_emb_p = jnp.zeros((H, c_pad), jnp.float32).at[:, :C].set(params["w_emb"])
    w_num_p = jnp.zeros((F, c_pad), jnp.float32).at[:, :C].set(params["w_num"])
    bias_p = jnp.zeros((1, c_pad), jnp.float32).at[:, :C].set(params["bias"])
    temp = params["temperature"].reshape(1, 1).astype(jnp.float32)           # (1, 1)

    kernel = functools.partial(_temp_model_kernel, num_classes=C)

    flops = (2 * b_pad * S * V            # weighted one-hot build
             + 2 * b_pad * V * H          # counts @ embedding
             + 2 * b_pad * (H + F) * c_pad
             + 6 * b_pad * c_pad)         # softmax / scaling
    transcendentals = b_pad * c_pad + b_pad
    bytes_accessed = 4 * (ids.size + mask.size + numf.size + lab.size
                          + emb_table.size + w_emb_p.size + w_num_p.size
                          + bias_p.size + temp.size
                          + b_pad * c_pad + b_pad)

    logits_pad, nll = pl.pallas_call(
        kernel,
        out_shape=(
            jax.ShapeDtypeStruct((b_pad, c_pad), jnp.float32),   # scaled logits
            jax.ShapeDtypeStruct((b_pad, 1), jnp.float32),       # per-row NLL
        ),
        grid=(num_tiles,),
        in_specs=[
            pl.BlockSpec((tile_b, S), lambda i: (i, 0)),          # input_ids
            pl.BlockSpec((tile_b, S), lambda i: (i, 0)),          # attention_mask
            pl.BlockSpec((tile_b, F), lambda i: (i, 0)),          # numerical feats
            pl.BlockSpec((tile_b, 1), lambda i: (i, 0)),          # labels
            pl.BlockSpec((V, H), lambda i: (0, 0)),               # embedding table
            pl.BlockSpec((H, c_pad), lambda i: (0, 0)),           # w_emb (padded C)
            pl.BlockSpec((F, c_pad), lambda i: (0, 0)),           # w_num (padded C)
            pl.BlockSpec((1, c_pad), lambda i: (0, 0)),           # bias  (padded C)
            pl.BlockSpec(memory_space=pltpu.MemorySpace.SMEM),    # temperature
        ],
        out_specs=(
            pl.BlockSpec((tile_b, c_pad), lambda i: (i, 0)),
            pl.BlockSpec((tile_b, 1), lambda i: (i, 0)),
        ),
        compiler_params=pltpu.CompilerParams(
            dimension_semantics=("parallel",),
            vmem_limit_bytes=32 * 1024 * 1024,
        ),
        cost_estimate=pl.CostEstimate(flops=flops,
                                      transcendentals=transcendentals,
                                      bytes_accessed=bytes_accessed),
    )(ids, mask, numf, lab, emb_table, w_emb_p, w_num_p, bias_p, temp)

    loss = jnp.sum(nll[:B, 0]) / jnp.float32(B)     # mean CE over real rows
    logits = logits_pad[:B, :C]                     # drop lane padding
    return loss, logits


def init_params(key, vocab=16, hidden=32, num_feat=4, num_classes=4):
    k_emb, k_w1, k_w2, k_b = jax.random.split(key, 4)
    return {
        "embedding": jax.random.normal(k_emb, (vocab, hidden), jnp.float32) * 0.1,
        "w_emb": jax.random.normal(k_w1, (hidden, num_classes), jnp.float32) * 0.1,
        "w_num": jax.random.normal(k_w2, (num_feat, num_classes), jnp.float32) * 0.1,
        "bias": jax.random.normal(k_b, (1, num_classes), jnp.float32) * 0.01,
        # nn.Parameter(torch.ones(1) * 1.5)
        "temperature": jnp.ones((1,), jnp.float32) * 1.5,
    }


def _reference(params, input_ids, attention_mask, numerical_features, labels):
    emb = params["embedding"][input_ids]
    mask = attention_mask.astype(jnp.float32)
    pooled = (emb * mask[:, :, None]).sum(1) / jnp.maximum(mask.sum(1, keepdims=True), 1.0)
    logits = pooled @ params["w_emb"] + numerical_features @ params["w_num"] + params["bias"]
    logp = jax.nn.log_softmax(logits, axis=1)
    loss = -jnp.mean(jnp.take_along_axis(logp, labels[:, None], axis=1))
    return loss, logits / params["temperature"][0]


if __name__ == "__main__":
    B, S, H, F, C, V = 16, 8, 32, 4, 4, 16
    key = jax.random.PRNGKey(0)
    k_par, k_ids, k_mask, k_num, k_lab = jax.random.split(key, 5)

    params = init_params(k_par, vocab=V, hidden=H, num_feat=F, num_classes=C)
    input_ids = jax.random.randint(k_ids, (B, S), 0, V)
    attention_mask = (jax.random.uniform(k_mask, (B, S)) > 0.2).astype(jnp.int32)
    numerical_features = jax.random.normal(k_num, (B, F), jnp.float32)
    labels = jax.random.randint(k_lab, (B,), 0, C)

    loss, logits = model_with_temperature_forward(
        params, input_ids, attention_mask, numerical_features, labels)
    jax.block_until_ready((loss, logits))

    ref_loss, ref_logits = _reference(
        params, input_ids, attention_mask, numerical_features, labels)
    # Tolerance covers MXU default-precision matmuls (pooling is a matmul in the
    # kernel vs exact elementwise accumulation in the reference).
    assert jnp.allclose(loss, ref_loss, atol=5e-3, rtol=5e-3), (loss, ref_loss)
    assert jnp.allclose(logits, ref_logits, atol=5e-3, rtol=5e-3)

    print("KERNEL_OK")
</pallas_src>

<mosaic_0001>
module attributes {stable_mosaic.version = 11 : i64} {
  func.func @_temp_model_kernel(%arg0: i32, %arg1: memref<8x8xi32, #tpu.memory_space<vmem>>, %arg2: memref<8x8xf32, #tpu.memory_space<vmem>>, %arg3: memref<8x4xf32, #tpu.memory_space<vmem>>, %arg4: memref<8x1xi32, #tpu.memory_space<vmem>>, %arg5: memref<16x32xf32, #tpu.memory_space<vmem>>, %arg6: memref<32x128xf32, #tpu.memory_space<vmem>>, %arg7: memref<4x128xf32, #tpu.memory_space<vmem>>, %arg8: memref<1x128xf32, #tpu.memory_space<vmem>>, %arg9: memref<1x1xf32, #tpu.memory_space<smem>>, %arg10: memref<8x128xf32, #tpu.memory_space<vmem>>, %arg11: memref<8x1xf32, #tpu.memory_space<vmem>>) attributes {dimension_semantics = [#tpu.dimension_semantics<parallel>], iteration_bounds = array<i64: 2>, scalar_prefetch = 0 : i64, scratch_operands = 0 : i64, tpu.core_type = #tpu.core_type<tc>, window_params = [{transform_indices = @transform_0, window_bounds = array<i64: 8, 8>}, {transform_indices = @transform_1, window_bounds = array<i64: 8, 8>}, {transform_indices = @transform_2, window_bounds = array<i64: 8, 4>}, {transform_indices = @transform_3, window_bounds = array<i64: 8, 1>}, {pipeline_mode = #tpu.pipeline_mode<synchronous>, transform_indices = @transform_4, window_bounds = array<i64: 16, 32>}, {pipeline_mode = #tpu.pipeline_mode<synchronous>, transform_indices = @transform_5, window_bounds = array<i64: 32, 128>}, {pipeline_mode = #tpu.pipeline_mode<synchronous>, transform_indices = @transform_6, window_bounds = array<i64: 4, 128>}, {pipeline_mode = #tpu.pipeline_mode<synchronous>, transform_indices = @transform_7, window_bounds = array<i64: 1, 128>}, {transform_indices = @transform_8, window_bounds = array<i64: 1, 1>}, {transform_indices = @transform_9, window_bounds = array<i64: 8, 128>}, {transform_indices = @transform_10, window_bounds = array<i64: 8, 1>}]} {
    %c0 = arith.constant 0 : index
    %c0_0 = arith.constant 0 : index
    %0 = vector.load %arg1[%c0, %c0_0] : memref<8x8xi32, #tpu.memory_space<vmem>>, vector<8x8xi32>
    %c0_1 = arith.constant 0 : index
    %c0_2 = arith.constant 0 : index
    %1 = vector.load %arg2[%c0_1, %c0_2] : memref<8x8xf32, #tpu.memory_space<vmem>>, vector<8x8xf32>
    %2 = tpu.iota {dimensions = array<i32: 2>} : vector<8x8x16xi32>
    %3 = vector.shape_cast %0 : vector<8x8xi32> to vector<8x8x1xi32>
    %4 = vector.broadcast %3 : vector<8x8x1xi32> to vector<8x8x16xi32>
    %5 = arith.cmpi eq, %4, %2 : vector<8x8x16xi32>
    %6 = vector.shape_cast %1 : vector<8x8xf32> to vector<8x8x1xf32>
    %cst = arith.constant 0.000000e+00 : f32
    %7 = vector.shape_cast %6 : vector<8x8x1xf32> to vector<8x8x1xf32>
    %8 = vector.broadcast %7 : vector<8x8x1xf32> to vector<8x8x16xf32>
    %9 = vector.broadcast %cst : f32 to vector<8x8x16xf32>
    %10 = arith.select %5, %8, %9 : vector<8x8x16xi1>, vector<8x8x16xf32>
    %cst_3 = arith.constant dense<0.000000e+00> : vector<8x16xf32>
    %11 = vector.multi_reduction <add>, %10, %cst_3 [1] : vector<8x8x16xf32> to vector<8x16xf32>
    %cst_4 = arith.constant dense<0.000000e+00> : vector<8xf32>
    %12 = vector.multi_reduction <add>, %1, %cst_4 [1] : vector<8x8xf32> to vector<8xf32>
    %13 = vector.shape_cast %12 : vector<8xf32> to vector<8x1xf32>
    %cst_5 = arith.constant 1.000000e+00 : f32
    %14 = vector.broadcast %cst_5 : f32 to vector<8x1xf32>
    %15 = arith.maximumf %13, %14 : vector<8x1xf32>
    %cst_6 = arith.constant 1.000000e+00 : f32
    %16 = vector.broadcast %cst_6 : f32 to vector<8x1xf32>
    %17 = arith.divf %16, %15 : vector<8x1xf32>
    %c0_7 = arith.constant 0 : index
    %c0_8 = arith.constant 0 : index
    %18 = vector.load %arg5[%c0_7, %c0_8] : memref<16x32xf32, #tpu.memory_space<vmem>>, vector<16x32xf32>
    %cst_9 = arith.constant dense<0.000000e+00> : vector<8x32xf32>
    %19 = tpu.matmul %11, %18, %cst_9 {dimension_numbers = #tpu.dot_dimension_numbers<[1], [0], [0], [1], [0, 0, 1, 1], [], []>} : vector<8x16xf32>, vector<16x32xf32>, vector<8x32xf32> -> vector<8x32xf32>
    %20 = vector.broadcast %17 : vector<8x1xf32> to vector<8x32xf32>
    %21 = arith.mulf %19, %20 : vector<8x32xf32>
    %c0_10 = arith.constant 0 : index
    %c0_11 = arith.constant 0 : index
    %22 = vector.load %arg6[%c0_10, %c0_11] : memref<32x128xf32, #tpu.memory_space<vmem>>, vector<32x128xf32>
    %cst_12 = arith.constant dense<0.000000e+00> : vector<8x128xf32>
    %23 = tpu.matmul %21, %22, %cst_12 {dimension_numbers = #tpu.dot_dimension_numbers<[1], [0], [0], [1], [0, 0, 1, 1], [], []>} : vector<8x32xf32>, vector<32x128xf32>, vector<8x128xf32> -> vector<8x128xf32>
    %c0_13 = arith.constant 0 : index
    %c0_14 = arith.constant 0 : index
    %24 = vector.load %arg3[%c0_13, %c0_14] : memref<8x4xf32, #tpu.memory_space<vmem>>, vector<8x4xf32>
    %c0_15 = arith.constant 0 : index
    %c0_16 = arith.constant 0 : index
    %25 = vector.load %arg7[%c0_15, %c0_16] : memref<4x128xf32, #tpu.memory_space<vmem>>, vector<4x128xf32>
    %cst_17 = arith.constant dense<0.000000e+00> : vector<8x128xf32>
    %26 = tpu.matmul %24, %25, %cst_17 {dimension_numbers = #tpu.dot_dimension_numbers<[1], [0], [0], [1], [0, 0, 1, 1], [], []>} : vector<8x4xf32>, vector<4x128xf32>, vector<8x128xf32> -> vector<8x128xf32>
    %27 = arith.addf %23, %26 : vector<8x128xf32>
    %c0_18 = arith.constant 0 : index
    %c0_19 = arith.constant 0 : index
    %28 = vector.load %arg8[%c0_18, %c0_19] : memref<1x128xf32, #tpu.memory_space<vmem>>, vector<1x128xf32>
    %29 = vector.broadcast %28 : vector<1x128xf32> to vector<8x128xf32>
    %30 = arith.addf %27, %29 : vector<8x128xf32>
    %31 = tpu.iota {dimensions = array<i32: 1>} : vector<8x128xi32>
    %c4_i32 = arith.constant 4 : i32
    %32 = vector.broadcast %c4_i32 : i32 to vector<8x128xi32>
    %33 = arith.cmpi slt, %31, %32 : vector<8x128xi32>
    %cst_20 = arith.constant -1.000000e+30 : f32
    %34 = vector.broadcast %cst_20 : f32 to vector<8x128xf32>
    %35 = arith.select %33, %30, %34 : vector<8x128xi1>, vector<8x128xf32>
    %cst_21 = arith.constant dense<0xFF800000> : vector<8xf32>
    %36 = vector.multi_reduction <maximumf>, %35, %cst_21 [1] : vector<8x128xf32> to vector<8xf32>
    %37 = vector.shape_cast %36 : vector<8xf32> to vector<8x1xf32>
    %38 = vector.broadcast %37 : vector<8x1xf32> to vector<8x128xf32>
    %39 = arith.subf %35, %38 : vector<8x128xf32>
    %40 = math.exp %39 : vector<8x128xf32>
    %cst_22 = arith.constant dense<0.000000e+00> : vector<8xf32>
    %41 = vector.multi_reduction <add>, %40, %cst_22 [1] : vector<8x128xf32> to vector<8xf32>
    %42 = vector.shape_cast %41 : vector<8xf32> to vector<8x1xf32>
    %43 = math.log %42 : vector<8x1xf32>
    %44 = vector.broadcast %43 : vector<8x1xf32> to vector<8x128xf32>
    %45 = arith.subf %39, %44 : vector<8x128xf32>
    %c0_23 = arith.constant 0 : index
    %c0_24 = arith.constant 0 : index
    %46 = vector.load %arg4[%c0_23, %c0_24] : memref<8x1xi32, #tpu.memory_space<vmem>>, vector<8x1xi32>
    %47 = vector.broadcast %46 : vector<8x1xi32> to vector<8x128xi32>
    %48 = arith.cmpi eq, %31, %47 : vector<8x128xi32>
    %cst_25 = arith.constant 0.000000e+00 : f32
    %49 = vector.broadcast %cst_25 : f32 to vector<8x128xf32>
    %50 = arith.select %48, %45, %49 : vector<8x128xi1>, vector<8x128xf32>
    %cst_26 = arith.constant dense<0.000000e+00> : vector<8xf32>
    %51 = vector.multi_reduction <add>, %50, %cst_26 [1] : vector<8x128xf32> to vector<8xf32>
    %52 = vector.shape_cast %51 : vector<8xf32> to vector<8x1xf32>
    %cst_27 = arith.constant 0.000000e+00 : f32
    %53 = vector.broadcast %cst_27 : f32 to vector<8x1xf32>
    %54 = arith.subf %53, %52 : vector<8x1xf32>
    %c0_28 = arith.constant 0 : index
    %c0_29 = arith.constant 0 : index
    %55 = vector.load %arg11[%c0_28, %c0_29] : memref<8x1xf32, #tpu.memory_space<vmem>>, vector<8x1xf32>
    tpu.vector_store %arg11[%c0_28, %c0_29], %54 {strides = array<i32>} : memref<8x1xf32, #tpu.memory_space<vmem>>, vector<8x1xf32>,
    %c0_30 = arith.constant 0 : index
    %c0_31 = arith.constant 0 : index
    %56 = memref.load %arg9[%c0_30, %c0_31] : memref<1x1xf32, #tpu.memory_space<smem>>
    %cst_32 = arith.constant 1.000000e+00 : f32
    %57 = arith.divf %cst_32, %56 : f32
    %58 = vector.broadcast %57 : f32 to vector<8x128xf32>
    %59 = arith.mulf %30, %58 : vector<8x128xf32>
    %c0_33 = arith.constant 0 : index
    %c0_34 = arith.constant 0 : index
    %60 = vector.load %arg10[%c0_33, %c0_34] : memref<8x128xf32, #tpu.memory_space<vmem>>, vector<8x128xf32>
    tpu.vector_store %arg10[%c0_33, %c0_34], %59 {strides = array<i32>} : memref<8x128xf32, #tpu.memory_space<vmem>>, vector<8x128xf32>,
    return
  }
  func.func @transform_0(%arg0: i32) -> (i32, i32) {
    %c0_i32 = arith.constant 0 : i32
    %c0_i32_0 = arith.constant 0 : i32
    return %arg0, %c0_i32 : i32, i32
  }
  func.func @transform_1(%arg0: i32) -> (i32, i32) {
    %c0_i32 = arith.constant 0 : i32
    %c0_i32_0 = arith.constant 0 : i32
    return %arg0, %c0_i32 : i32, i32
  }
  func.func @transform_2(%arg0: i32) -> (i32, i32) {
    %c0_i32 = arith.constant 0 : i32
    %c0_i32_0 = arith.constant 0 : i32
    return %arg0, %c0_i32 : i32, i32
  }
  func.func @transform_3(%arg0: i32) -> (i32, i32) {
    %c0_i32 = arith.constant 0 : i32
    %c0_i32_0 = arith.constant 0 : i32
    return %arg0, %c0_i32 : i32, i32
  }
  func.func @transform_4(%arg0: i32) -> (i32, i32) {
    %c0_i32 = arith.constant 0 : i32
    %c0_i32_0 = arith.constant 0 : i32
    %c0_i32_1 = arith.constant 0 : i32
    return %c0_i32, %c0_i32_0 : i32, i32
  }
  func.func @transform_5(%arg0: i32) -> (i32, i32) {
    %c0_i32 = arith.constant 0 : i32
    %c0_i32_0 = arith.constant 0 : i32
    %c0_i32_1 = arith.constant 0 : i32
    return %c0_i32, %c0_i32_0 : i32, i32
  }
  func.func @transform_6(%arg0: i32) -> (i32, i32) {
    %c0_i32 = arith.constant 0 : i32
    %c0_i32_0 = arith.constant 0 : i32
    %c0_i32_1 = arith.constant 0 : i32
    return %c0_i32, %c0_i32_0 : i32, i32
  }
  func.func @transform_7(%arg0: i32) -> (i32, i32) {
    %c0_i32 = arith.constant 0 : i32
    %c0_i32_0 = arith.constant 0 : i32
    %c0_i32_1 = arith.constant 0 : i32
    return %c0_i32, %c0_i32_0 : i32, i32
  }
  func.func @transform_8(%arg0: i32) -> (i32, i32) {
    %c0_i32 = arith.constant 0 : i32
    %c0_i32_0 = arith.constant 0 : i32
    %c0_i32_1 = arith.constant 0 : i32
    return %c0_i32, %c0_i32_0 : i32, i32
  }
  func.func @transform_9(%arg0: i32) -> (i32, i32) {
    %c0_i32 = arith.constant 0 : i32
    %c0_i32_0 = arith.constant 0 : i32
    return %arg0, %c0_i32 : i32, i32
  }
  func.func @transform_10(%arg0: i32) -> (i32, i32) {
    %c0_i32 = arith.constant 0 : i32
    %c0_i32_0 = arith.constant 0 : i32
    return %arg0, %c0_i32 : i32, i32
  }
}

</mosaic_0001>

<bundles_post_ra>
// kernel: tpu_custom_call.1
= control target key start
LH: loop header
LB: loop body
LE: loop exit
PB: predicated region body
PF: predicated region fallthrough
CT: control target
= control target key end

     0   :  { %s1449_s0 = inlined_call_operand.vmem [shape: s32[16,8], index: 0, kind: input, shape index: {}]   ;;  %s1450_s1 = inlined_call_operand.vmem [shape: f32[16,8], index: 1, kind: input, shape index: {}]   ;;  %s1451_s2 = inlined_call_operand.vmem [shape: f32[16,4], index: 2, kind: input, shape index: {}]   ;;  %s1452_s3 = inlined_call_operand.vmem [shape: s32[16,1], index: 3, kind: input, shape index: {}]   ;;  %s1453_s4 = inlined_call_operand.vmem [shape: f32[16,32], index: 4, kind: input, shape index: {}]   ;;  %s1454_s5 = inlined_call_operand.vmem [shape: f32[32,128], index: 5, kind: input, shape index: {}]   ;;  %s1455_s6 = inlined_call_operand.vmem [shape: f32[4,128], index: 6, kind: input, shape index: {}]   ;;  %s1456_s7 = inlined_call_operand.vmem [shape: f32[1,128], index: 7, kind: input, shape index: {}]   ;;  %s1457_s8 = inlined_call_operand.<no memory space> [shape: f32[1,1], index: 8, kind: input, shape index: {}]   ;;  %s1458_s9 = inlined_call_operand.hbm [shape: f32[16,128], index: 9, kind: output, shape index: {0}]   ;;  %s1459_s10 = inlined_call_operand.vmem [shape: f32[16,1], index: 10, kind: output, shape index: {1}]  }
   0x1   :  { %1460 = sst [smem:[#allocation6_spill]] %s1449_s0 }
   0x2   :  { %16 = sst [smem:[#allocation2]] %s1457_s8 }
   0x3   :  { %17 = vsyncpa [#allocation4], 0 }
   0x4   :  { %19 = vsyncpa [#allocation4 + $0x1], 0  ;;  %s1276_s15 = smov 0   ;;  %s1278_s16 = smov 0  }
   0x5   :  { %s1280_s17 = smov 0   ;;  %s1282_s18 = smov 0  }
   0x6 LB: > { %s1297_s8 = sadd.s32 4294967295, %s1212_s18   ;;  %s1047_s19 = sadd.s32 4294967294, %s1212_s18   ;;  %s1212_s18 = sphi %s1282_s18, %s1467_s18   ;;  %s1208_s17 = sphi %s1280_s17, %s1466_s17   ;;  %s1204_s16 = sphi %s1278_s16, %s1465_s16   ;;  %s1200_s15 = sphi %s1276_s15, %s1464_s15  }
   0x7   : > { %s1301_s20 = sadd.s32 1, %s1212_s18   ;;  %s241_s21 = sadd.s32 1, %s1208_s17 }
   0x8   : > { %s238_s22 = ssub.s32 %s1212_s18, %s1301_s20  ;;  %p251_p0 = scmp.ne.s32.totalorder %s1208_s17, %s1204_s16 }
   0x9   : > { %p239_p1 = scmp.eq.s32.totalorder %s238_s22, 0  ;;  %p252_p2 = scmp.eq.s32.totalorder %s1297_s8, 1 }
   0xa   : > { %p257_p3 = scmp.ne.s32.totalorder %s1204_s16, %s1200_s15  ;;  %p258_p4 = scmp.eq.s32.totalorder %s1047_s19, 1 }
   0xb   : > { %s1312_s23 = scalar_select %p239_p1, %s1208_s17, %s241_s21  }
   0xc   : > { %p1314_p5 = por %p252_p2, %p251_p0  ;;  %p1318_p6 = por %p258_p4, %p257_p3 }
   0xd   : > { %p1050_p7 = scmp.ge.s32.totalorder %s1212_s18, 1  ;;  %p345_p8 = scmp.lt.s32.totalorder %s1212_s18, 3 }
   0xf   : > { %p346_p9 = pnand %p1050_p7, %p345_p8 }
  0x10   : > { %p398_p10 = scmp.lt.s32.totalorder (!%p346_p9), %s1297_s8, 1  ;;  %s1463_s0 = sld [smem:[#allocation6_spill]] (!%p346_p9) }
  0x11   : > { %349 = sbr.rel (%p346_p9) target bundleno = 1036 (0x40c), region = 56  ;;  %s900_s29 = sld [smem:[#allocation2]] (!%p346_p9) }
  0x12   : > { %s1063_s28 = sshll.u32 (!%p346_p9), %s1297_s8, 7 }
  0x16   : > { %v420_v0 = vlaneseq  ;;  %s399_s26 = scalar_select %p398_p10, %s1297_s8, 1  ;;  %v615_v28 = vld [vmem:[%s1453_s4 + $0x8] sm:$0xff]  ;;  %v1214_v29 = vmov 0.0   ;;  %v614_v30 = vld [vmem:[%s1453_s4] sm:$0xff]  ;;  %vm1215_vm0 = vmmov 0   ;;  %vm607_vm1 = vcmask 64512  }
  0x17   : > { %1076 = vmatprep.subr.mxu0 %v1214_v29  ;;  %1080 = vmatprep.mubr.msk.f32.mxu0 %vm1215_vm0, %v1214_v29  ;;  %v714_v32 = vld [vmem:[%s1454_s5 + $0x18] sm:$0xff]  ;;  %v713_v33 = vld [vmem:[%s1454_s5 + $0x10] sm:$0xff]  ;;  %vm550_vm4 = vcmask 130048   ;;  %vm624_vm11 = vcmask 1041409   ;;  %vm626_vm12 = vcmask 1042434   ;;  %vm628_vm13 = vcmask 1043459  }
  0x18   : > { %v423_v1 = vshrl.u32 %v420_v0, 7  ;;  %s1327_s27 = sshll.u32 %s399_s26, 3  ;;  %1077 = vmatpush3.msra.mxu0 %v615_v28  ;;  %1088 = vmatprep.subr.mxu1 %v1214_v29  ;;  %v1360_v38 = vand.u32 127, %v420_v0  ;;  %vm630_vm14 = vcmask 1044484   ;;  %vm632_vm15 = vcmask 1045509  }
  0x19   : > { %s401_s30 = scalar_lea.vmem %s1463_s0, %s1327_s27  ;;  %s405_s13 = scalar_lea.vmem %s1450_s1, %s1327_s27  ;;  %1078 = vmatprep.subr.mxu0 %v1214_v29  ;;  %1096 = vmatprep.mubr.msk.f32.mxu1 %vm1215_vm0, %v1214_v29 }
  0x1a   : > { %v438_v2 = vsub.s32 2, %v423_v1  ;;  %v424_v3 = vsub.s32 0, %v423_v1  ;;  %v431_v4 = vsub.s32 1, %v423_v1  ;;  %v418_v5 = vld [vmem:[%s401_s30] sm:$0xff]  ;;  %v445_v11 = vsub.s32 3, %v423_v1  ;;  %1079 = vmatpush3.msra.mxu0 %v614_v30  ;;  %1089 = vmatpush3.msra.mxu1 %v714_v32  ;;  %s409_s22 = scalar_lea.vmem %s1451_s2, %s1327_s27  ;;  %s389_s30 = sand.u32 1, %s1204_s16  }
  0x1b   : > { %v419_v6 = vld [vmem:[%s405_s13] sm:$0xff]  ;;  %v452_v14 = vsub.s32 4, %v423_v1  ;;  %v459_v17 = vsub.s32 5, %v423_v1  ;;  %v466_v20 = vsub.s32 6, %v423_v1  ;;  %v473_v23 = vsub.s32 7, %v423_v1  ;;  %1083 = vmatprep.subr.mxu0 %v1214_v29  ;;  %1090 = vmatprep.subr.mxu1 %v1214_v29  ;;  %s1401_s14 = sshll.u32 %s389_s30, 3  ;;  %s413_s26 = scalar_lea.vmem %s1452_s3, %s1327_s27 }
  0x1c   : > { %v439_v7 = vrot.slane %v418_v5, %v438_v2  ;;  %v425_v8 = vrot.slane %v418_v5, %v424_v3  ;;  %v489_v9 = vrot.slane %v419_v6, %v424_v3  ;;  %v432_v10 = vrot.slane %v418_v5, %v431_v4  ;;  %1091 = vmatpush3.msra.mxu1 %v713_v33  ;;  %s391_s19 = scalar_lea.vmem [#allocation3], %s1401_s14  ;;  %s923_s13 = scalar_lea.hbm %s1458_s9, %s1063_s28 }
  0x1d   : > { %v446_v12 = vrot.slane %v418_v5, %v445_v11  ;;  %v496_v13 = vrot.slane %v419_v6, %v431_v4  ;;  %v453_v15 = vrot.slane %v418_v5, %v452_v14  ;;  %v503_v16 = vrot.slane %v419_v6, %v438_v2  ;;  %1092 = vmatprep.subr.mxu1 %v1214_v29  ;;  %s908_s14 = scalar_lea.sflag [#allocation4], %s389_s30 }
  0x1e   : > { %441 = vbcast.lane.b32.xlu1 %v439_v7, 256  ;;  %427 = vbcast.lane.b32.xlu0 %v425_v8, 256  ;;  %v460_v18 = vrot.slane %v418_v5, %v459_v17  ;;  %v510_v19 = vrot.slane %v419_v6, %v445_v11  ;;  %v467_v21 = vrot.slane %v418_v5, %v466_v20  ;;  %v608_v31 = vsel %vm607_vm1, %v419_v6, 0.0 }
  0x1f   : > { %v517_v22 = vrot.slane %v419_v6, %v452_v14  ;;  %v474_v24 = vrot.slane %v418_v5, %v473_v23  ;;  %v524_v25 = vrot.slane %v419_v6, %v459_v17  ;;  %v538_v26 = vrot.slane %v419_v6, %v473_v23 }
  0x20   : > { %v531_v27 = vrot.slane %v419_v6, %v466_v20  ;;  %vm634_vm1 = vcmask 1046534  }
  0x22   : > { %491 = vbcast.lane.b32.xlu1 %v489_v9, 256  ;;  %434 = vbcast.lane.b32.xlu0 %v432_v10, 256 }
  0x26   : > { %448 = vbcast.lane.b32.xlu1 %v446_v12, 256  ;;  %498 = vbcast.lane.b32.xlu0 %v496_v13, 256 }
  0x2a   : > { %455 = vbcast.lane.b32.xlu1 %v453_v15, 256  ;;  %505 = vbcast.lane.b32.xlu0 %v503_v16, 256 }
  0x2e   : > { %462 = vbcast.lane.b32.xlu1 %v460_v18, 256  ;;  %512 = vbcast.lane.b32.xlu0 %v510_v19, 256 }
  0x32   : > { %469 = vbcast.lane.b32.xlu1 %v467_v21, 256  ;;  %519 = vbcast.lane.b32.xlu0 %v517_v22, 256 }
  0x36   : > { %476 = vbcast.lane.b32.xlu1 %v474_v24, 256  ;;  %526 = vbcast.lane.b32.xlu0 %v524_v25, 256 }
  0x3a   : > { %540 = vbcast.lane.b32.xlu1 %v538_v26, 256  ;;  %533 = vbcast.lane.b32.xlu0 %v531_v27, 256 }
  0x59   : > { %609 = vadd.xlane.f32.xlu0 %v608_v31 }
  0x90   : > { %v442_v34 = vpop.permute.xlu1 %441  ;;  %v428_v35 = vpop.permute.xlu0 %427 }
  0x91   : > { %vm478_vm3 = vcmp.eq.s32.totalorder %v428_v35, %v1360_v38  ;;  %vm480_vm5 = vcmp.eq.s32.totalorder %v442_v34, %v1360_v38 }
  0x94   : > { %v492_v36 = vpop.permute.xlu1 %491  ;;  %v435_v37 = vpop.permute.xlu0 %434 }
  0x95   : > { %vm479_vm2 = vcmp.eq.s32.totalorder %v435_v37, %v1360_v38  ;;  %v542_v42 = vsel %vm478_vm3, %v492_v36, 0.0  ;;  %vm721_vm3 = vcmask 1043456  }
  0x96   : > { %v551_v46 = vsel %vm550_vm4, %v542_v42, 0.0 }
  0x97   : > { %v552_v51 = vrot.slane %v551_v46, 4 }
  0x98   : > { %v449_v39 = vpop.permute.xlu1 %448  ;;  %v499_v40 = vpop.permute.xlu0 %498 }
  0x99   : > { %v543_v41 = vsel %vm479_vm2, %v499_v40, 0.0  ;;  %vm481_vm6 = vcmp.eq.s32.totalorder %v449_v39, %v1360_v38  ;;  %v553_v58 = vadd.f32 %v552_v51, %v551_v46  ;;  %vm636_vm2 = vcmask 1047559  }
  0x9a   : > { %v558_v43 = vsel %vm550_vm4, %v543_v41, 0.0 }
  0x9b   : > { %v559_v48 = vrot.slane %v558_v43, 4  ;;  %v554_v4 = vrot.slane %v553_v58, 2 }
  0x9c   : > { %v456_v44 = vpop.permute.xlu1 %455  ;;  %v506_v45 = vpop.permute.xlu0 %505 }
  0x9d   : > { %v544_v47 = vsel %vm480_vm5, %v506_v45, 0.0  ;;  %v560_v54 = vadd.f32 %v559_v48, %v558_v43  ;;  %vm482_vm7 = vcmp.eq.s32.totalorder %v456_v44, %v1360_v38  ;;  %v555_v15 = vadd.f32 %v554_v4, %v553_v58 }
  0x9e   : > { %v565_v49 = vsel %vm550_vm4, %v544_v47, 0.0  ;;  %vm717_vm5 = vcmask 31744  }
  0x9f   : > { %v566_v50 = vrot.slane %v565_v49, 4  ;;  %v561_v63 = vrot.slane %v560_v54, 2  ;;  %v556_v31 = vrot.slane %v555_v15, 1 }
  0xa0   : > { %v463_v52 = vpop.permute.xlu1 %462  ;;  %v513_v53 = vpop.permute.xlu0 %512 }
  0xa1   : > { %v545_v55 = vsel %vm481_vm6, %v513_v53, 0.0  ;;  %v567_v56 = vadd.f32 %v566_v50, %v565_v49  ;;  %vm483_vm8 = vcmp.eq.s32.totalorder %v463_v52, %v1360_v38  ;;  %v562_v10 = vadd.f32 %v561_v63, %v560_v54  ;;  %v711_v63 = vld [vmem:[%s1454_s5] sm:$0xff] }
  0xa2   : > { %v572_v57 = vsel %vm550_vm4, %v545_v55, 0.0  ;;  %v557_v43 = vadd.f32 %v556_v31, %v555_v15 }
  0xa3   : > { %v573_v59 = vrot.slane %v572_v57, 4  ;;  %v568_v2 = vrot.slane %v567_v56, 2  ;;  %v563_v23 = vrot.slane %v562_v10, 1 }
  0xa4   : > { %v470_v60 = vpop.permute.xlu1 %469  ;;  %v520_v61 = vpop.permute.xlu0 %519 }
  0xa5   : > { %v546_v62 = vsel %vm482_vm7, %v520_v61, 0.0  ;;  %v574_v0 = vadd.f32 %v573_v59, %v572_v57  ;;  %v569_v12 = vadd.f32 %v568_v2, %v567_v56  ;;  %vm484_vm9 = vcmp.eq.s32.totalorder %v470_v60, %v1360_v38  ;;  %v716_v59 = vld [vmem:[%s1455_s6] sm:$0xf]  ;;  %v712_v61 = vld [vmem:[%s1454_s5 + $0x8] sm:$0xff] }
  0xa6   : > { %v579_v1 = vsel %vm550_vm4, %v546_v62, 0.0  ;;  %v564_v37 = vadd.f32 %v563_v23, %v562_v10  ;;  %1093 = vmatpush3.msra.mxu1 %v712_v61  ;;  %v715_v62 = vld [vmem:[%s409_s22] sm:$0xff]  ;;  %s1217_s22 = smov [#allocation3]  }
  0xa7   : > { %v580_v3 = vrot.slane %v579_v1, 4  ;;  %v575_v5 = vrot.slane %v574_v0, 2  ;;  %v570_v26 = vrot.slane %v569_v12, 1  ;;  %1094 = vmatprep.subr.mxu1 %v1214_v29  ;;  %v1061_v10 = vld [vmem:[%s1456_s7] ss:$0 sm:$0xff] }
  0xa8   : > { %v477_v6 = vpop.permute.xlu1 %476  ;;  %v527_v7 = vpop.permute.xlu0 %526  ;;  %v625_v48 = vsel %vm624_vm11, %v564_v37, %v557_v43  ;;  %1095 = vmatpush3.msra.mxu1 %v711_v63 }
  0xa9   : > { %v581_v8 = vadd.f32 %v580_v3, %v579_v1  ;;  %v547_v9 = vsel %vm483_vm8, %v527_v7, 0.0  ;;  %v576_v16 = vadd.f32 %v575_v5, %v574_v0  ;;  %vm485_vm10 = vcmp.eq.s32.totalorder %v477_v6, %v1360_v38 }
  0xaa   : > { %v586_v11 = vsel %vm550_vm4, %v547_v9, 0.0  ;;  %v571_v39 = vadd.f32 %v570_v26, %v569_v12  ;;  %v901_v0 = vstv %s900_s29  ;;  %s925_s29 = sshll.u32 %s391_s19, 4  ;;  %s926_s29 = int_to_ptr.vmem [resolvable:$true] %s925_s29 }
  0xab   : > { %v582_v13 = vrot.slane %v581_v8, 2  ;;  %v587_v14 = vrot.slane %v586_v11, 4  ;;  %v577_v32 = vrot.slane %v576_v16, 1  ;;  %1144 = vrcp.f32 %v901_v0  ;;  %s1152_s21 = scalar_lea.vmem %s926_s29, 128 }
  0xac   : > { %v541_v17 = vpop.permute.xlu1 %540  ;;  %v534_v18 = vpop.permute.xlu0 %533  ;;  %v627_v50 = vsel %vm626_vm12, %v571_v39, %v625_v48  ;;  %p1153_p11 = scmp.ne.s32.totalorder %s926_s29, %s1152_s21 }
  0xad   : > { %v583_v19 = vadd.f32 %v582_v13, %v581_v8  ;;  %v588_v20 = vadd.f32 %v587_v14, %v586_v11  ;;  %v549_v21 = vsel %vm485_vm10, %v541_v17, 0.0  ;;  %v548_v22 = vsel %vm484_vm9, %v534_v18, 0.0 }
  0xae   : > { %v600_v24 = vsel %vm550_vm4, %v549_v21, 0.0  ;;  %v593_v25 = vsel %vm550_vm4, %v548_v22, 0.0  ;;  %v578_v44 = vadd.f32 %v577_v32, %v576_v16  ;;  %v1216_v17 = vmov 0   ;;  %v889_v22 = vld [vmem:[%s413_s26] sm:$0xff]  ;;  %p1154_p12 = pnand %p1153_p11, %p1314_p5  ;;  %s1156_s26 = sshll.u32 %s1217_s22, 4  ;;  %s1157_s26 = int_to_ptr.vmem [resolvable:$false] %s1156_s26 }
  0xaf   : > { %v589_v27 = vrot.slane %v588_v20, 2  ;;  %v601_v28 = vrot.slane %v600_v24, 4  ;;  %v594_v30 = vrot.slane %v593_v25, 4  ;;  %v584_v33 = vrot.slane %v583_v19, 1  ;;  %1143 = vset.pattern.permute.xlu0 %v1216_v17  ;;  %s1158_s0 = scalar_lea.vmem %s1157_s26, 256  ;;  %p1159_p0 = scmp.lt.s32.totalorder %s926_s29, %s1157_s26 }
  0xb0   : > { %v629_v53 = vsel %vm628_vm13, %v578_v44, %v627_v50  ;;  %p1155_p13 = pneg %p1154_p12  ;;  %p1160_p1 = scmp.lt.s32.totalorder %s1158_s0, %s1152_s21 }
  0xb1   : > { %v590_v34 = vadd.f32 %v589_v27, %v588_v20  ;;  %v602_v35 = vadd.f32 %v601_v28, %v600_v24  ;;  %v595_v36 = vadd.f32 %v594_v30, %v593_v25  ;;  %v585_v45 = vadd.f32 %v584_v33, %v583_v19 }
  0xb2   : > { %p1161_p2 = por %p1160_p1, %p1159_p0 }
  0xb3   : > { %v591_v40 = vrot.slane %v590_v34, 1  ;;  %v603_v41 = vrot.slane %v602_v35, 2  ;;  %v596_v42 = vrot.slane %v595_v36, 2  ;;  %v631_v56 = vsel %vm630_vm14, %v585_v45, %v629_v53 }
  0xb4   : > { %p1162_p3 = pnand %p1161_p2, %p1155_p13 }
  0xb5   : > { %v604_v46 = vadd.f32 %v603_v41, %v602_v35  ;;  %v597_v47 = vadd.f32 %v596_v42, %v595_v36  ;;  %v592_v49 = vadd.f32 %v591_v40, %v590_v34 }
  0xb7   : > { %v605_v51 = vrot.slane %v604_v46, 1  ;;  %v598_v52 = vrot.slane %v597_v47, 1  ;;  %v633_v57 = vsel %vm632_vm15, %v592_v49, %v631_v56 }
  0xb8   : > { %v1145_v1 = vpop.eup %1144 }
  0xb9   : > { %v606_v54 = vadd.f32 %v605_v51, %v604_v46  ;;  %v599_v55 = vadd.f32 %v598_v52, %v597_v47  ;;  %1099 = vpush %v1145_v1 }
  0xbb   : > { %v635_v58 = vsel %vm634_vm1, %v599_v55, %v633_v57 }
  0xbc   : > { %v637_v60 = vsel %vm636_vm2, %v606_v54, %v635_v58 }
  0xbd   : > { %1081 = vmatmul.mubr.msk.f32.vlgmr.msra.gmra.mxu0 %vm550_vm4, %v637_v60  ;;  %vm877_vm4 = vcmp.lt.s32.totalorder %v1360_v38, 4 }
  0xbe   : > { %1084 = vmatpush3.msk.msra.mxu0 %vm721_vm3, %v716_v59  ;;  %1085 = vmatprep.mubr.msk.f32.mxu0 %vm1215_vm0, %v1214_v29  ;;  %vm795_vm0 = vcmask 261120  }
  0xc1   : > { %1086 = vmatmul.mubr.msk.f32.vlgmr.msra.gmra.mxu0 %vm717_vm5, %v715_v62 }
  0xe2   : > { %v610_v2 = vpop.xlane.xlu0 %609 }
  0xe3   : > { %v611_v3 = vmax.f32 %v610_v2, 1.0 }
  0xe5   : > { %1146 = vrcp.f32 %v611_v3 }
  0xea   : > { %s1100_s11 = spop %1099 }
  0xeb   : > { %v904_v13 = vstv %s1100_s11 }
  0xf2   : > { %v1147_v4 = vpop.eup %1146 }
 0x17d   : > { %v706_v5 = vpop.f32.mrf.mxu0 }
 0x17e   : > { %v710_v6 = vmul.f32 %v1147_v4, %v706_v5 }
 0x17f   : > { %v1082_v29 = vpop.f32.mrf.mxu0 }
 0x180   : > { %1097 = vmatmul.mubr.msk.f32.vlgmr.msra.gmra.mxu1 %vm795_vm0, %v710_v6 }
 0x181   : > { %v791_v7 = vpop.f32.mrf.mxu0 }
 0x183   : > { %v1087_v8 = vpop.f32.mrf.mxu0 }
 0x240   : > { %v865_v9 = vpop.f32.mrf.mxu1 }
 0x241   : > { %v866_v11 = vadd.f32 %v865_v9, %v791_v7 }
 0x242   : > { %v1098_v12 = vpop.f32.mrf.mxu1 }
 0x243   : > { %v876_v14 = vadd.f32 %v1061_v10, %v866_v11 }
 0x245   : > { %v905_v15 = vmul.f32 %v904_v13, %v876_v14  ;;  %v878_v16 = vsel %vm877_vm4, %v876_v14, -1e+30 }
 0x246   : > { %879 = vmax.xlane.f32.xlu1 %v878_v16 }
 0x247   : > { %906 = vst [vmem:[%s391_s19] sm:$0xff] %v905_v15 }
 0x2cf   : > { %v880_v18 = vpop.xlane.xlu1 %879 }
 0x2d0   : > { %v881_v19 = vsub.f32 %v878_v16, %v880_v18 }
 0x2d2   : > { %v882_v20 = vmul.f32 1.442695, %v881_v19 }
 0x2d4   : > { %1148 = vpow2.f32 %v882_v20 }
 0x2e1   : > { %v1149_v21 = vpop.eup %1148 }
 0x2e2   : > { %884 = vadd.xlane.f32.xlu0 %v1149_v21 }
 0x2f8   : > { %891 = vperm.xlu0 %1143, %v889_v22  }
 0x36b   : > { %v885_v23 = vpop.xlane.xlu0 %884 }
 0x36c   : > { %1150 = vlog2.f32 %v885_v23 }
 0x373   : > { %v892_v24 = vpop.permute.xlu0 %891 }
 0x374   : > { %vm893_vm6 = vcmp.eq.s32.totalorder %v1360_v38, %v892_v24 }
 0x379   : > { %v1151_v25 = vpop.eup %1150 }
 0x37a   : > { %v887_v26 = vmul.f32 0.6931472, %v1151_v25 }
 0x37c   : > { %v888_v27 = vsub.f32 %v881_v19, %v887_v26 }
 0x37e   : > { %v894_v28 = vsel %vm893_vm6, %v888_v27, 0.0 }
 0x37f   : > { %895 = vadd.xlane.f32.xlu1 %v894_v28 }
 0x380   : > { %1165 = shalt.err (!%p1162_p3)
}
 0x381   : > { %s1166_s8 = scalar_lea.hbm %s923_s13, 128  ;;  %s1170_s28 = scalar_lea.hbm %s1458_s9, 256 }
 0x382   : > { %p1167_p4 = scmp.ne.s32.totalorder %s923_s13, %s1166_s8  ;;  %p1171_p9 = scmp.lt.s32.totalorder %s923_s13, %s1458_s9 }
 0x383   : > { %p1172_p10 = scmp.lt.s32.totalorder %s1170_s28, %s1166_s8 }
 0x384   : > { %p1168_p7 = pnand %p1167_p4, %p1314_p5 }
 0x385   : > { %p1173_p11 = por %p1172_p10, %p1171_p9 }
 0x386   : > { %p1169_p8 = pneg %p1168_p7 }
 0x388   : > { %p1174_p12 = pnand %p1173_p11, %p1169_p8 }
 0x38a   : > { %1177 = shalt.err (!%p1174_p12)
}
 0x38b   : > { %1101 = dma.vmem_to_hbm [thread:$0]  (%p1314_p5), %s926_s29, 128, %s923_s13, %s908_s14   ;;  %vm898_vm7 = vcmask 7168  }
 0x38c   : > { %s417_s22 = scalar_lea.vmem %s1459_s10, %s1327_s27 }
 0x408   : > { %v896_v38 = vpop.xlane.xlu1 %895 }
 0x409   : > { %v897_v30 = vsub.f32 0.0, %v896_v38 }
 0x40b   : > { %899 = vst.msk [vmem:[%s417_s22] sm:$0xff] %vm898_vm7, %v897_v30 }
 0x40c PF: > { %p1107_p13 = scmp.ge.s32.totalorder %s1212_s18, 2  ;;  %s940_s26 = sand.u32 1, %s1200_s15  }
 0x40d   : > { %s941_s24 = scalar_lea.sflag [#allocation4], %s940_s26 }
 0x40e   : > { %p1104_p0 = pnand %p1107_p13, %p1318_p6 }
 0x410   : > { %p1105_p1 = pneg %p1104_p0 }
 0x412   : > { %1195 = dma.done.wait (%p1105_p1), %s941_s24, 128  }
 0x413   : > { %1197 = vsyncadd (%p1105_p1), %s941_s24, 4294967168  ;;  %p22_p5 = scmp.ge.s32.totalorder %s1301_s20, 4   ;;  %s1464_s15 = smov %s1204_s16 }
 0x414   : > { %s1465_s16 = smov %s1208_s17  ;;  %s1466_s17 = smov %s1312_s23 }
 0x415   : > { %s1467_s18 = smov %s1301_s20  ;;  %24 = sbr.rel (!%p22_p5) target bundleno = 6 (0x6), region = 112 }
 0x41a   :  { %953 = vsyncpa [#allocation4], 1 }
 0x41b   :  { %955 = vsyncpa [#allocation4 + $0x1], 1 }

</bundles_post_ra>
